<compile_context>
chip_gen: v7x
topology: tpu7x:2x2x1
jax: 0.10.0
libtpu: 0.0.40
codegen_flags: <defaults>
</compile_context>

<pallas_src>
import jax
import jax.numpy as jnp
from jax import lax
from jax.experimental import pallas as pl
from jax.experimental.pallas import tpu as pltpu

EPS = 1e-05
_F_NORMALIZE_EPS = 1e-12  # torch.nn.functional.normalize default eps


def _so4_quat_kernel(params_ref, out_ref):
    # params_ref: (6,) f32 in SMEM -> [p0, p1, p2, q0, q1, q2]
    # out_ref:    (2, 4) f32 in VMEM -> row 0 = quat(p), row 1 = quat(q)
    p0, p1, p2 = params_ref[0], params_ref[1], params_ref[2]
    q0, q1, q2 = params_ref[3], params_ref[4], params_ref[5]

    # Squared norms from SMEM scalars — no XLU cross-lane reduce.
    sq_p = p0 * p0 + p1 * p1 + p2 * p2
    sq_q = q0 * q0 + q1 * q1 + q2 * q2

    row_col = lax.broadcasted_iota(jnp.int32, (8, 1), 0)      # (8, 1)
    row = lax.broadcasted_iota(jnp.int32, (8, 128), 0)        # (8, 128)
    lane = lax.broadcasted_iota(jnp.int32, (8, 128), 1)       # (8, 128)

    # Row 0 = p, rows 1..7 = q (rows 2..7 are dropped by the (2,4) slice).
    sq = jnp.where(row_col == 0, sq_p, sq_q)                  # (8, 1)
    angle = jnp.sqrt(sq)                                      # (8, 1)
    half = angle * 0.5
    cos_h = jnp.cos(half)                                     # (8, 1)
    sin_h = jnp.sin(half)                                     # (8, 1)

    # axis_n * sin(half) == p * sin(half) / angle: the +EPS and the follow-up
    # F.normalize cancel algebraically for angle >= EPS.  Rows with
    # angle < EPS are overwritten by the identity select below, so the max()
    # guard only shields against inf/nan, never changes observable results.
    inv_angle = pl.reciprocal(jnp.maximum(angle, EPS), approx=False)
    scale = sin_h * inv_angle                                 # (8, 1)

    # Vreg only for final assembly: xyz components placed in lanes 1..3.
    xyz = jnp.where(
        row == 0,
        jnp.where(lane == 1, p0,
                  jnp.where(lane == 2, p1,
                            jnp.where(lane == 3, p2, 0.0))),
        jnp.where(lane == 1, q0,
                  jnp.where(lane == 2, q1,
                            jnp.where(lane == 3, q2, 0.0))))  # (8, 128)

    quat = jnp.where(lane == 0, cos_h, xyz * scale)           # (8, 128)
    identity = jnp.where(lane == 0, 1.0, 0.0)                 # [1,0,0,...]
    result = jnp.where(angle < EPS, identity, quat)           # (8, 128)

    out_ref[...] = result[0:2, 0:4].astype(out_ref.dtype)


def quaternion_so4_from_6params(so3_params_for_p, so3_params_for_q):
    """Returns (q_p, q_q), each of shape (1, 4), dtype float32."""
    params = jnp.concatenate([
        so3_params_for_p.astype(jnp.float32).reshape(3),
        so3_params_for_q.astype(jnp.float32).reshape(3),
    ])                                                        # (6,) f32
    out = pl.pallas_call(
        _so4_quat_kernel,
        out_shape=jax.ShapeDtypeStruct((2, 4), jnp.float32),
        in_specs=[pl.BlockSpec(memory_space=pltpu.MemorySpace.SMEM)],
        out_specs=pl.BlockSpec(memory_space=pltpu.MemorySpace.VMEM),
    )(params)
    return out[0:1, :], out[1:2, :]


def _reference(so3_params):
    """Pure-JAX reference mirroring the PyTorch semantics (generic-branch shape)."""
    angle = jnp.linalg.norm(so3_params)
    axis = so3_params / (angle + EPS)
    axis_n = axis / jnp.maximum(jnp.linalg.norm(axis), _F_NORMALIZE_EPS)
    half = angle / 2.0
    quat = jnp.concatenate([jnp.cos(half)[None], axis_n * jnp.sin(half)])[None, :]
    identity = jnp.array([[1.0, 0.0, 0.0, 0.0]], jnp.float32)
    return jnp.where(angle < EPS, identity, quat)


if __name__ == "__main__":
    key = jax.random.PRNGKey(0)
    kp, kq = jax.random.split(key)
    small_init_std = 0.001
    # Deterministic stand-in for nn.Parameter(torch.randn(3) * small_init_std)
    so3_params_for_p = jax.random.normal(kp, (3,), jnp.float32) * small_init_std
    so3_params_for_q = jax.random.normal(kq, (3,), jnp.float32) * small_init_std

    q_p, q_q = quaternion_so4_from_6params(so3_params_for_p, so3_params_for_q)
    q_p, q_q = jax.block_until_ready((q_p, q_q))

    ref_p = _reference(so3_params_for_p)
    ref_q = _reference(so3_params_for_q)

    assert q_p.shape == (1, 4) and q_q.shape == (1, 4)
    assert jnp.allclose(q_p, ref_p, atol=1e-6), (q_p, ref_p)
    assert jnp.allclose(q_q, ref_q, atol=1e-6), (q_q, ref_q)
    # Unit-norm sanity check on the generic branch.
    assert jnp.allclose(jnp.linalg.norm(q_p), 1.0, atol=1e-5)
    assert jnp.allclose(jnp.linalg.norm(q_q), 1.0, atol=1e-5)

    # Small-angle branch: zero params -> identity quaternion.
    zeros = jnp.zeros((3,), jnp.float32)
    q_id, _ = jax.block_until_ready(quaternion_so4_from_6params(zeros, zeros))
    assert jnp.allclose(q_id, jnp.array([[1.0, 0.0, 0.0, 0.0]]), atol=1e-7), q_id

    print("KERNEL_OK")
</pallas_src>

<mosaic_0001>
module attributes {stable_mosaic.version = 11 : i64} {
  func.func @_so4_quat_kernel(%arg0: memref<6xf32, #tpu.memory_space<smem>>, %arg1: memref<2x4xf32, #tpu.memory_space<vmem>>) attributes {dimension_semantics = [], scalar_prefetch = 0 : i64, scratch_operands = 0 : i64, tpu.core_type = #tpu.core_type<tc>} {
    %c0 = arith.constant 0 : index
    %0 = memref.load %arg0[%c0] : memref<6xf32, #tpu.memory_space<smem>>
    %c1 = arith.constant 1 : index
    %1 = memref.load %arg0[%c1] : memref<6xf32, #tpu.memory_space<smem>>
    %c2 = arith.constant 2 : index
    %2 = memref.load %arg0[%c2] : memref<6xf32, #tpu.memory_space<smem>>
    %c3 = arith.constant 3 : index
    %3 = memref.load %arg0[%c3] : memref<6xf32, #tpu.memory_space<smem>>
    %c4 = arith.constant 4 : index
    %4 = memref.load %arg0[%c4] : memref<6xf32, #tpu.memory_space<smem>>
    %c5 = arith.constant 5 : index
    %5 = memref.load %arg0[%c5] : memref<6xf32, #tpu.memory_space<smem>>
    %6 = arith.mulf %0, %0 : f32
    %7 = arith.mulf %1, %1 : f32
    %8 = arith.addf %6, %7 : f32
    %9 = arith.mulf %2, %2 : f32
    %10 = arith.addf %8, %9 : f32
    %11 = arith.mulf %3, %3 : f32
    %12 = arith.mulf %4, %4 : f32
    %13 = arith.addf %11, %12 : f32
    %14 = arith.mulf %5, %5 : f32
    %15 = arith.addf %13, %14 : f32
    %16 = tpu.iota {dimensions = array<i32: 0>} : vector<8x1xi32>
    %17 = tpu.iota {dimensions = array<i32: 0>} : vector<8x128xi32>
    %18 = tpu.iota {dimensions = array<i32: 1>} : vector<8x128xi32>
    %c0_i32 = arith.constant 0 : i32
    %19 = vector.broadcast %c0_i32 : i32 to vector<8x1xi32>
    %20 = arith.cmpi eq, %16, %19 : vector<8x1xi32>
    %21 = vector.broadcast %10 : f32 to vector<8x1xf32>
    %22 = vector.broadcast %15 : f32 to vector<8x1xf32>
    %23 = arith.select %20, %21, %22 : vector<8x1xi1>, vector<8x1xf32>
    %24 = math.sqrt %23 : vector<8x1xf32>
    %cst = arith.constant 5.000000e-01 : f32
    %25 = vector.broadcast %cst : f32 to vector<8x1xf32>
    %26 = arith.mulf %24, %25 : vector<8x1xf32>
    %27 = math.cos %26 : vector<8x1xf32>
    %28 = math.sin %26 : vector<8x1xf32>
    %cst_0 = arith.constant 9.99999974E-6 : f32
    %29 = vector.broadcast %cst_0 : f32 to vector<8x1xf32>
    %30 = arith.maximumf %24, %29 : vector<8x1xf32>
    %31 = tpu.reciprocal %30 : vector<8x1xf32> -> vector<8x1xf32>
    %32 = arith.mulf %28, %31 : vector<8x1xf32>
    %c0_i32_1 = arith.constant 0 : i32
    %33 = vector.broadcast %c0_i32_1 : i32 to vector<8x128xi32>
    %34 = arith.cmpi eq, %17, %33 : vector<8x128xi32>
    %c1_i32 = arith.constant 1 : i32
    %35 = vector.broadcast %c1_i32 : i32 to vector<8x128xi32>
    %36 = arith.cmpi eq, %18, %35 : vector<8x128xi32>
    %c2_i32 = arith.constant 2 : i32
    %37 = vector.broadcast %c2_i32 : i32 to vector<8x128xi32>
    %38 = arith.cmpi eq, %18, %37 : vector<8x128xi32>
    %c3_i32 = arith.constant 3 : i32
    %39 = vector.broadcast %c3_i32 : i32 to vector<8x128xi32>
    %40 = arith.cmpi eq, %18, %39 : vector<8x128xi32>
    %cst_2 = arith.constant 0.000000e+00 : f32
    %41 = vector.broadcast %2 : f32 to vector<8x128xf32>
    %42 = vector.broadcast %cst_2 : f32 to vector<8x128xf32>
    %43 = arith.select %40, %41, %42 : vector<8x128xi1>, vector<8x128xf32>
    %44 = vector.broadcast %1 : f32 to vector<8x128xf32>
    %45 = arith.select %38, %44, %43 : vector<8x128xi1>, vector<8x128xf32>
    %46 = vector.broadcast %0 : f32 to vector<8x128xf32>
    %47 = arith.select %36, %46, %45 : vector<8x128xi1>, vector<8x128xf32>
    %c1_i32_3 = arith.constant 1 : i32
    %48 = vector.broadcast %c1_i32_3 : i32 to vector<8x128xi32>
    %49 = arith.cmpi eq, %18, %48 : vector<8x128xi32>
    %c2_i32_4 = arith.constant 2 : i32
    %50 = vector.broadcast %c2_i32_4 : i32 to vector<8x128xi32>
    %51 = arith.cmpi eq, %18, %50 : vector<8x128xi32>
    %c3_i32_5 = arith.constant 3 : i32
    %52 = vector.broadcast %c3_i32_5 : i32 to vector<8x128xi32>
    %53 = arith.cmpi eq, %18, %52 : vector<8x128xi32>
    %cst_6 = arith.constant 0.000000e+00 : f32
    %54 = vector.broadcast %5 : f32 to vector<8x128xf32>
    %55 = vector.broadcast %cst_6 : f32 to vector<8x128xf32>
    %56 = arith.select %53, %54, %55 : vector<8x128xi1>, vector<8x128xf32>
    %57 = vector.broadcast %4 : f32 to vector<8x128xf32>
    %58 = arith.select %51, %57, %56 : vector<8x128xi1>, vector<8x128xf32>
    %59 = vector.broadcast %3 : f32 to vector<8x128xf32>
    %60 = arith.select %49, %59, %58 : vector<8x128xi1>, vector<8x128xf32>
    %61 = arith.select %34, %47, %60 : vector<8x128xi1>, vector<8x128xf32>
    %c0_i32_7 = arith.constant 0 : i32
    %62 = vector.broadcast %c0_i32_7 : i32 to vector<8x128xi32>
    %63 = arith.cmpi eq, %18, %62 : vector<8x128xi32>
    %64 = vector.broadcast %32 : vector<8x1xf32> to vector<8x128xf32>
    %65 = arith.mulf %61, %64 : vector<8x128xf32>
    %66 = vector.shape_cast %27 : vector<8x1xf32> to vector<8x1xf32>
    %67 = vector.broadcast %66 : vector<8x1xf32> to vector<8x128xf32>
    %68 = arith.select %63, %67, %65 : vector<8x128xi1>, vector<8x128xf32>
    %c0_i32_8 = arith.constant 0 : i32
    %69 = vector.broadcast %c0_i32_8 : i32 to vector<8x128xi32>
    %70 = arith.cmpi eq, %18, %69 : vector<8x128xi32>
    %cst_9 = arith.constant 1.000000e+00 : f32
    %cst_10 = arith.constant 0.000000e+00 : f32
    %71 = vector.broadcast %cst_9 : f32 to vector<8x128xf32>
    %72 = vector.broadcast %cst_10 : f32 to vector<8x128xf32>
    %73 = arith.select %70, %71, %72 : vector<8x128xi1>, vector<8x128xf32>
    %cst_11 = arith.constant 9.99999974E-6 : f32
    %74 = vector.broadcast %cst_11 : f32 to vector<8x1xf32>
    %75 = arith.cmpf olt, %24, %74 : vector<8x1xf32>
    %76 = vector.shape_cast %75 : vector<8x1xi1> to vector<8x1xi1>
    %77 = vector.broadcast %76 : vector<8x1xi1> to vector<8x128xi1>
    %78 = arith.select %77, %73, %68 : vector<8x128xi1>, vector<8x128xf32>
    %79 = vector.extract_strided_slice %78 {offsets = [0, 0], sizes = [2, 4], strides = [1, 1]} : vector<8x128xf32> to vector<2x4xf32>
    %c0_12 = arith.constant 0 : index
    %c0_13 = arith.constant 0 : index
    %80 = vector.load %arg1[%c0_12, %c0_13] : memref<2x4xf32, #tpu.memory_space<vmem>>, vector<2x4xf32>
    tpu.vector_store %arg1[%c0_12, %c0_13], %79 {strides = array<i32>} : memref<2x4xf32, #tpu.memory_space<vmem>>, vector<2x4xf32>,
    return
  }
}

</mosaic_0001>

<bundles_post_ra>
// kernel: tpu_custom_call.1
= control target key start
LH: loop header
LB: loop body
LE: loop exit
PB: predicated region body
PF: predicated region fallthrough
CT: control target
= control target key end

     0   :  { %6 = vsyncpa [#allocation4], 0  ;;  %s478_s0 = inlined_call_operand.hbm [shape: f32[6], index: 0, kind: input, shape index: {}]   ;;  %s479_s1 = inlined_call_operand.hbm [shape: f32[2,4], index: 1, kind: output, shape index: {}]  }
   0x1   :  { %7 = vsyncpa [#allocation3], 0  ;;  %s337_s8 = scalar_lea.hbm %s478_s0, 16 }
   0x2   :  { %p338_p0 = scmp.ne.s32.totalorder %s478_s0, %s337_s8  ;;  %p341_p1 = scmp.lt.u32.totalorder %s337_s8, %s478_s0 }
   0x4   :  { %p343_p2 = pnand %p341_p1, %p338_p0 }
   0x6   :  { %346 = shalt.err (!%p343_p2)
}
   0x7   :  { %s373_s13 = smov [#allocation2]  }
   0x8   :  { %15 = dma.hbm_to_smem %s478_s0, 16, %s373_s13, [#allocation4]  }
   0x9   :  { %369 = dma.done.wait [#allocation4], 16  }
   0xa   :  { %370 = vsyncadd [#allocation4], 4294967280 }
   0xb   :  { %19 = sfence }
   0xc   :  { %s20_s16 = sld [smem:[#allocation2]]  ;;  %s303_s17 = sld [smem:[#allocation2 + $0x1]]  ;;  %v36_v0 = vlaneseq  ;;  %v374_v36 = vmov 683565275   ;;  %v375_v38 = vmov 2475754826  }
   0xd   :  { %s304_s18 = sld [smem:[#allocation2 + $0x2]]  ;;  %s404_s19 = sld [smem:[#allocation2 + $0x3]]  ;;  %v376_v40 = vmov 2131351028   ;;  %v377_v42 = vmov 2102212464  }
   0xe   :  { %s406_s20 = sld [smem:[#allocation2 + $0x4]]  ;;  %s408_s21 = sld [smem:[#allocation2 + $0x5]]  ;;  %v410_v1 = vand.u32 127, %v36_v0  ;;  %v37_v3 = vshrl.u32 %v36_v0, 7  ;;  %v378_v44 = vmov 920167782  }
   0xf   :  { %v379_v51 = vmov 1326507024   ;;  %s380_s2 = smov [#allocation5]  }
  0x10   :  { %vm264_vm0 = vcmp.eq.s32.totalorder %v410_v1, 3  ;;  %vm263_vm1 = vcmp.eq.s32.totalorder %v410_v1, 2  ;;  %vm262_vm2 = vcmp.eq.s32.totalorder %v410_v1, 1  ;;  %vm40_vm3 = vcmp.eq.s32.totalorder %v37_v3, 0  ;;  %s294_s3 = sshll.u32 %s380_s2, 4  ;;  %s295_s3 = int_to_ptr.vmem [resolvable:$true] %s294_s3 }
  0x11   :  { %s347_s4 = scalar_lea.vmem %s295_s3, 32  ;;  %p352_p4 = scmp.lt.s32.totalorder %s295_s3, %s295_s3 }
  0x12   :  { %s26_s0 = smul.f32 %s20_s16, %s20_s16  ;;  %v267_v2 = vstv %s303_s17  ;;  %v269_v5 = vstv %s20_s16  ;;  %p348_p3 = scmp.ne.s32.totalorder %s295_s3, %s347_s4 }
  0x13   :  { %s27_s22 = smul.f32 %s303_s17, %s303_s17  ;;  %v265_v4 = vstv %s304_s18  ;;  %v275_v9 = vstv %s404_s19  ;;  %p353_p5 = scmp.lt.s32.totalorder %s347_s4, %s347_s4 }
  0x14   :  { %s29_s23 = smul.f32 %s304_s18, %s304_s18  ;;  %v266_v6 = vsel %vm264_vm0, %v265_v4, 0.0  ;;  %v271_v7 = vstv %s408_s21  ;;  %v273_v8 = vstv %s406_s20 }
  0x15   :  { %s28_s24 = sadd.f32 %s27_s22, %s26_s0  ;;  %s31_s25 = smul.f32 %s404_s19, %s404_s19  ;;  %v268_v10 = vsel %vm263_vm1, %v267_v2, %v266_v6  ;;  %v272_v11 = vsel %vm264_vm0, %v271_v7, 0.0 }
  0x16   :  { %s32_s26 = smul.f32 %s406_s20, %s406_s20  ;;  %v270_v12 = vsel %vm262_vm2, %v269_v5, %v268_v10  ;;  %v274_v13 = vsel %vm263_vm1, %v273_v8, %v272_v11  ;;  %p354_p6 = por %p353_p5, %p352_p4 }
  0x17   :  { %s30_s27 = sadd.f32 %s29_s23, %s28_s24  ;;  %s34_s28 = smul.f32 %s408_s21, %s408_s21  ;;  %v276_v14 = vsel %vm262_vm2, %v275_v9, %v274_v13 }
  0x18   :  { %s33_s29 = sadd.f32 %s32_s26, %s31_s25  ;;  %v436_v15 = vsel %vm40_vm3, %v270_v12, %v276_v14  ;;  %p355_p7 = pnand %p354_p6, %p348_p3 }
  0x19   :  { %v41_v16 = vstv %s30_s27 }
  0x1a   :  { %s35_s30 = sadd.f32 %s34_s28, %s33_s29 }
  0x1c   :  { %v42_v17 = vstv %s35_s30 }
  0x1d   :  { %v43_v18 = vsel %vm40_vm3, %v41_v16, %v42_v17 }
  0x1e   :  { %329 = vrsqrt.f32 %v43_v18  ;;  %vm46_vm4 = vcmp.eq.f32.partialorder %v43_v18, inf  ;;  %v49_v20 = vand.u32 2147483648, %v43_v18  ;;  %vm48_vm5 = vcmp.eq.f32.partialorder %v43_v18, 0.0 }
  0x28   :  { %v330_v19 = vpop.eup %329 }
  0x29   :  { %v45_v21 = vmul.f32 %v330_v19, %v43_v18 }
  0x2b   :  { %v47_v22 = vsel %vm46_vm4, %v43_v18, %v45_v21 }
  0x2c   :  { %v438_v23 = vsel %vm48_vm5, %v49_v20, %v47_v22 }
  0x2d   :  { %v441_v24 = vmul.f32 0.5, %v438_v23 }
  0x2f   :  { %v55_v25 = vand.u32 2139095040, %v441_v24  ;;  %v52_v27 = vand.u32 2147483647, %v441_v24  ;;  %vm54_vm13 = vcmp.lt.s32.totalorder %v441_v24, 0  ;;  %vm144_vm5 = vweird.f32 %v441_v24 }
  0x31   :  { %v56_v26 = vshrl.u32 %v55_v25, 23  ;;  %v59_v30 = vand.u32 8388607, %v52_v27  ;;  %vm53_vm14 = vcmp.le.f32.partialorder %v52_v27, 0.7853982 }
  0x33   :  { %v308_v28 = vadd.s32 4294967169, %v56_v26  ;;  %v60_v33 = vor.u32 8388608, %v59_v30 }
  0x35   :  { %v62_v29 = vadd.s32 1, %v308_v28  ;;  %v100_v53 = vshll.u32 %v60_v33, 8 }
  0x37   :  { %vm63_vm6 = vcmp.gt.s32.totalorder %v62_v29, 0 }
  0x38   :  { %v64_v31 = vsel %vm63_vm6, %v62_v29, 0  ;;  %vm278_vm6 = vcmp.eq.s32.totalorder %v410_v1, 0 }
  0x39   :  { %v66_v32 = vand.u32 31, %v64_v31  ;;  %v65_v34 = vshrl.u32 %v64_v31, 5 }
  0x3b   :  { %v67_v35 = vsub.s32 32, %v66_v32  ;;  %v69_v37 = vshll.u32 %v374_v36, %v66_v32  ;;  %v72_v39 = vshll.u32 %v375_v38, %v66_v32  ;;  %v75_v41 = vshll.u32 %v376_v40, %v66_v32 }
  0x3c   :  { %v78_v43 = vshll.u32 %v377_v42, %v66_v32  ;;  %v81_v45 = vshll.u32 %v378_v44, %v66_v32  ;;  %vm84_vm7 = vcmp.lt.s32.totalorder %v65_v34, 1  ;;  %vm87_vm8 = vcmp.lt.s32.totalorder %v65_v34, 4 }
  0x3d   :  { %v68_v46 = vshrl.u32 %v374_v36, %v67_v35  ;;  %v70_v47 = vshrl.u32 %v375_v38, %v67_v35  ;;  %v73_v48 = vshrl.u32 %v376_v40, %v67_v35  ;;  %v76_v49 = vshrl.u32 %v377_v42, %v67_v35 }
  0x3e   :  { %v79_v50 = vshrl.u32 %v378_v44, %v67_v35  ;;  %v82_v52 = vshrl.u32 %v379_v51, %v67_v35  ;;  %vm85_vm9 = vcmp.lt.s32.totalorder %v65_v34, 2  ;;  %vm86_vm10 = vcmp.lt.s32.totalorder %v65_v34, 3 }
  0x3f   :  { %v71_v54 = vor.u32 %v70_v47, %v69_v37  ;;  %v74_v55 = vor.u32 %v73_v48, %v72_v39  ;;  %v77_v56 = vor.u32 %v76_v49, %v75_v41  ;;  %v259_v47 = vmax.f32 %v438_v23, 1e-05 }
  0x40   :  { %v80_v57 = vor.u32 %v79_v50, %v78_v43  ;;  %v83_v58 = vor.u32 %v82_v52, %v81_v45 }
  0x41   :  { %v88_v59 = vsel %vm84_vm7, %v68_v46, %v71_v54  ;;  %v89_v60 = vsel %vm87_vm8, %v77_v56, 2102212464  ;;  %v92_v61 = vsel %vm84_vm7, %v71_v54, %v74_v55  ;;  %v96_v62 = vsel %vm84_vm7, %v74_v55, %v77_v56 }
  0x42   :  { %v90_v63 = vsel %vm86_vm10, %v74_v55, %v89_v60  ;;  %v93_v0 = vsel %vm87_vm8, %v80_v57, 920167782  ;;  %v97_v2 = vsel %vm87_vm8, %v83_v58, 1326507024  ;;  %vm282_vm7 = vcmp.lt.f32.partialorder %v438_v23, 1e-05 }
  0x43   :  { %v94_v3 = vsel %vm86_vm10, %v77_v56, %v93_v0  ;;  %v98_v4 = vsel %vm86_vm10, %v80_v57, %v97_v2  ;;  %v91_v5 = vsel %vm85_vm9, %v88_v59, %v90_v63  ;;  %v381_v2 = vmov 0.0  }
  0x44   :  { %v95_v6 = vsel %vm85_vm9, %v92_v61, %v94_v3  ;;  %v99_v7 = vsel %vm85_vm9, %v96_v62, %v98_v4  ;;  %v107_v12 = vmul.u32 %v100_v53, %v91_v5  ;;  %v281_v3 = vsel %vm278_vm6, 1.0, %v381_v2 }
  0x45   :  { %v447_v8 = vmul.u32.u64.low %v100_v53, %v99_v7  ;;  %v448_v9 = vmul.u32.u64.high %v100_v53, %v99_v7, %v447_v8  ;;  %v450_v10 = vmul.u32.u64.low %v100_v53, %v95_v6  ;;  %v451_v11 = vmul.u32.u64.high %v100_v53, %v95_v6, %v450_v10 }
  0x46   :  { %vm286_vm8 = vcmask 25600  }
  0x47   :  { %vm109_vm11 = vc.u32 %v448_v9, %v450_v10  ;;  %v110_v13 = vadd.s32 1, %v451_v11  ;;  %v108_v28 = vadd.s32 %v450_v10, %v448_v9 }
  0x49   :  { %v111_v14 = vsel %vm109_vm11, %v110_v13, %v451_v11 }
  0x4a   :  { %v112_v16 = vadd.s32 %v111_v14, %v107_v12 }
  0x4c   :  { %v113_v17 = vadd.s32 536870912, %v112_v16 }
  0x4e   :  { %v114_v18 = vshrl.u32 %v113_v17, 30 }
  0x50   :  { %v115_v19 = vshll.u32 %v114_v18, 30  ;;  %v138_v40 = vsub.s32 4, %v114_v18 }
  0x52   :  { %v116_v20 = vsub.s32 %v112_v16, %v115_v19  ;;  %v139_v43 = vsel %vm54_vm13, %v138_v40, %v114_v18 }
  0x53   :  { %v141_v46 = vsel %vm53_vm14, 0, %v139_v43 }
  0x54   :  { %v118_v21 = vsub.s32 0, %v116_v20  ;;  %v248_v48 = vadd.s32 3, %v141_v46  ;;  %v145_v49 = vand.u32 3, %v141_v46 }
  0x56   :  { %v309_v22 = vmin.u32 %v118_v21, %v116_v20  ;;  %v249_v50 = vand.u32 3, %v248_v48  ;;  %vm150_vm15 = vcmp.eq.s32.totalorder %v145_v49, 2  ;;  %vm147_vm1 = vcmp.eq.s32.totalorder %v145_v49, 0 }
  0x57   :  { %vm146_vm3 = vcmp.lt.s32.totalorder %v145_v49, 2 }
  0x58   :  { %v120_v25 = vclz %v309_v22  ;;  %vm254_vm0 = vcmp.eq.s32.totalorder %v249_v50, 2  ;;  %vm251_vm2 = vcmp.eq.s32.totalorder %v249_v50, 0  ;;  %vm250_vm4 = vcmp.lt.s32.totalorder %v249_v50, 2 }
  0x5a   :  { %v310_v26 = vadd.s32 4294967294, %v120_v25 }
  0x5c   :  { %vm311_vm12 = vcmp.lt.s32.totalorder %v310_v26, 0 }
  0x5d   :  { %v123_v29 = vsel %vm311_vm12, 0, %v310_v26 }
  0x5e   :  { %v124_v30 = vsub.s32 32, %v123_v29  ;;  %v125_v31 = vshll.u32 %v116_v20, %v123_v29  ;;  %v128_v32 = vsub.s32 4294967266, %v123_v29 }
  0x60   :  { %v126_v33 = vshrl.u32 %v108_v28, %v124_v30  ;;  %v129_v34 = vadd.s32 127, %v128_v32 }
  0x62   :  { %v127_v35 = vor.u32 %v126_v33, %v125_v31  ;;  %v130_v36 = vshll.u32 %v129_v34, 23 }
  0x64   :  { %v131_v37 = vor.u32 4788187, %v130_v36  ;;  %v134_v38 = vcvt.s32.f32 %v127_v35 }
  0x66   :  { %v132_v39 = vand.u32 2147483647, %v131_v37 }
  0x68   :  { %v135_v41 = vmul.f32 %v134_v38, %v132_v39 }
  0x6a   :  { %v136_v42 = vxor.u32 2147483648, %v135_v41 }
  0x6c   :  { %v137_v44 = vsel %vm54_vm13, %v136_v42, %v135_v41 }
  0x6d   :  { %v140_v45 = vsel %vm53_vm14, %v441_v24, %v137_v44 }
  0x6e   :  { %331 = vcosq.f32 %v140_v45 }
  0x6f   :  { %333 = vsinq.f32 %v140_v45 }
  0x70   :  { %335 = vrcp.f32 %v259_v47 }
  0x78   :  { %v332_v51 = vpop.eup %331 }
  0x79   :  { %v334_v52 = vpop.eup %333  ;;  %v151_v27 = vxor.u32 2147483648, %v332_v51 }
  0x7a   :  { %v148_v53 = vxor.u32 2147483648, %v334_v52  ;;  %v336_v56 = vpop.eup %335 }
  0x7b   :  { %v152_v54 = vsel %vm150_vm15, %v151_v27, %v334_v52  ;;  %v256_v55 = vsel %vm254_vm0, %v151_v27, %v334_v52 }
  0x7c   :  { %v149_v57 = vsel %vm147_vm1, %v332_v51, %v148_v53  ;;  %v253_v58 = vsel %vm251_vm2, %v332_v51, %v148_v53 }
  0x7d   :  { %v153_v59 = vsel %vm146_vm3, %v149_v57, %v152_v54  ;;  %v257_v60 = vsel %vm250_vm4, %v253_v58, %v256_v55 }
  0x7e   :  { %v258_v61 = vsel %vm144_vm5, nan, %v257_v60  ;;  %v154_v63 = vsel %vm144_vm5, nan, %v153_v59 }
  0x7f   :  { %v261_v62 = vmul.f32 %v336_v56, %v258_v61 }
  0x81   :  { %v279_v0 = vmul.f32 %v436_v15, %v261_v62 }
  0x83   :  { %v280_v24 = vsel %vm278_vm6, %v154_v63, %v279_v0 }
  0x84   :  { %v285_v4 = vsel %vm282_vm7, %v281_v3, %v280_v24 }
  0x85   :  { %287 = vst.msk [vmem:[#allocation5] sm:$0x3] %vm286_vm8, %v285_v4 }
  0x86   :  { %358 = shalt.err (!%p355_p7)
}
  0x87   :  { %s359_s7 = scalar_lea.hbm %s479_s1, 32 }
  0x88   :  { %p360_p8 = scmp.ne.s32.totalorder %s479_s1, %s359_s7  ;;  %p363_p9 = scmp.lt.u32.totalorder %s359_s7, %s479_s1 }
  0x8a   :  { %p365_p10 = pnand %p363_p9, %p360_p8 }
  0x8c   :  { %368 = shalt.err (!%p365_p10)
}
  0x8d   :  { %297 = dma.vmem_to_hbm [thread:$0]  %s295_s3, 32, %s479_s1, [#allocation3]  }
  0x8e   :  { %371 = dma.done.wait [#allocation3], 32  }
  0x8f   :  { %372 = vsyncadd [#allocation3], 4294967264 }
  0x90   :  { %301 = vsyncpa [#allocation3], 1 }
  0x91   :  { %302 = vsyncpa [#allocation4], 1 }

</bundles_post_ra>
